<compile_context>
chip_gen: v7x
topology: tpu7x:2x2x1
jax: 0.10.0
libtpu: 0.0.40
codegen_flags: <defaults>
</compile_context>

<pallas_src>
import functools

import jax
import jax.numpy as jnp
from jax.experimental import pallas as pl
from jax.experimental.pallas import tpu as pltpu

LANES = 128      # lane-padded channel width (covers Cin=10 and H=32)
TAP_BLOCK = 32   # lanes reserved per conv tap inside the packed contraction


def _round_up(x, m):
    return (x + m - 1) // m * m


def _lane_shift(v, shift, width):
    """Equivalent to jnp.roll(v, shift, axis=-1) with a static shift."""
    if shift == 0:
        return v
    return jnp.concatenate([v[:, width - shift:], v[:, :width - shift]], axis=-1)


def _make_fused_tcn_kernel(dilations, Bt, T, K, C, halo_top, seg):
    """All layers for a Bt-sized batch tile; activation kept in VMEM."""
    num_layers = len(dilations)

    def kernel(x_ref, w_ref, b_ref, o_ref, act_ref):
        # x_ref:   (Bt, T, C)    f32 channel-padded input
        # w_ref:   (L, C, C)     bf16 packed weights (tap k -> rows k*TAP_BLOCK..)
        # b_ref:   (L, 1, C)     f32 biases
        # o_ref:   (Bt, T, C)    f32 output (lane-dense; sliced on host)
        # act_ref: (Bt, seg, C)  bf16 activation slab with zero halos
        halo_bot = seg - halo_top - T

        for b in range(Bt):
            # Zero ONLY the halo strips; live rows are overwritten right away
            # and halo rows are never written again, so the conv "same" zero
            # padding holds for every layer/dilation.
            act_ref[b, :halo_top, :] = jnp.zeros((halo_top, C), jnp.bfloat16)
            act_ref[b, halo_top + T:, :] = jnp.zeros((halo_bot, C), jnp.bfloat16)
            act_ref[b, halo_top:halo_top + T, :] = x_ref[b].astype(jnp.bfloat16)

        for layer in range(num_layers):          # static unroll (L is small)
            d = dilations[layer]
            pad = (K - 1) * d // 2
            last = layer == num_layers - 1

            # Packed im2col: tap k's (<=32 live) channels are lane-shifted to
            # lanes [k*TAP_BLOCK, k*TAP_BLOCK+32).  Lanes >= 32 of every tap
            # are zero by construction, so the shifted adds are collision-free.
            rows = []
            for b in range(Bt):
                packed = None
                for k in range(K):
                    start = halo_top + k * d - pad
                    tap = act_ref[b, start:start + T, :]
                    tap = _lane_shift(tap, k * TAP_BLOCK, C)
                    packed = tap if packed is None else packed + tap
                rows.append(packed)
            slab = rows[0] if Bt == 1 else jnp.concatenate(rows, axis=0)

            # One (Bt*T, 128) @ (128, 128) MXU matmul per layer, f32 accumulate.
            acc = jnp.dot(slab, w_ref[layer], preferred_element_type=jnp.float32)
            act = jnp.maximum(acc + b_ref[layer], 0.0)      # bias + ReLU in f32
            # TODO(synk): training-mode Dropout (stochastic masking) is not
            # implemented; eval/identity semantics are used.

            if last:
                # Peeled last layer: write straight to the output block.
                o_ref[...] = act.reshape(Bt, T, C).astype(o_ref.dtype)
            else:
                nxt = act.astype(jnp.bfloat16).reshape(Bt, T, C)
                for b in range(Bt):
                    act_ref[b, halo_top:halo_top + T, :] = nxt[b]

    return kernel


def _choose_bt(B, T):
    """Batch tile per grid step: fill MXU rows but keep >=2 steps when B>=2."""
    cap = max(1, min(B, max(1, 256 // max(T, 1)), 8))
    if B >= 2:
        cap = max(1, min(cap, B // 2))   # v7x: leave work for both TensorCores
    for bt in range(cap, 0, -1):
        if B % bt == 0:
            return bt
    return 1


@functools.partial(jax.jit,
                   static_argnames=("dilations", "hidden_size", "kernel_size"))
def tcn_forward(x, W_all, b_all, dilations, hidden_size, kernel_size=3):
    """Full TCN forward.  x: (B, T, C_in) -> (B, T, hidden_size)."""
    B, T, Cin = x.shape
    L, C, C2 = W_all.shape
    assert C == C2 == LANES
    assert T % 8 == 0, "T must be a multiple of 8 for (8,128) tiling"

    max_d = max(dilations)
    pad_max = (kernel_size - 1) * max_d // 2
    halo_top = _round_up(max(pad_max, 1), 16)     # bf16 sublane-tile aligned
    halo_bot = _round_up(max(pad_max, 1), 16)
    seg = halo_top + T + halo_bot

    Bt = _choose_bt(B, T)
    grid = (B // Bt,)

    # Pad input channels to the lane width once (padded channels are inert:
    # the corresponding packed-weight rows are zero).
    x_pad = jnp.pad(x, ((0, 0), (0, 0), (0, C - Cin)))

    kernel = _make_fused_tcn_kernel(dilations, Bt, T, kernel_size, C,
                                    halo_top, seg)

    # Explicit VMEM budget (v7x: 64 MiB physical / 32 MiB default scoped).
    blk_io = Bt * T * C * 4
    est = (2 * 2 * blk_io                          # double-buffered in/out blocks
           + 2 * (L * C * C * 2 + L * C * 4)       # weights + bias (2 buffers)
           + Bt * seg * C * 2                      # bf16 activation slab
           + 8 * blk_io)                           # per-layer temporaries headroom
    vmem_limit = int(min(64 * 1024 * 1024, max(4 * est, 8 * 1024 * 1024)))

    out = pl.pallas_call(
        kernel,
        out_shape=jax.ShapeDtypeStruct((B, T, C), x.dtype),
        grid=grid,
        in_specs=[
            pl.BlockSpec((Bt, T, C), lambda i: (i, 0, 0)),
            pl.BlockSpec((L, C, C), lambda i: (0, 0, 0)),   # weights resident
            pl.BlockSpec((L, 1, C), lambda i: (0, 0, 0)),   # biases resident
        ],
        out_specs=pl.BlockSpec((Bt, T, C), lambda i: (i, 0, 0)),
        scratch_shapes=[pltpu.VMEM((Bt, seg, C), jnp.bfloat16)],
        compiler_params=pltpu.CompilerParams(
            dimension_semantics=("parallel",),
            vmem_limit_bytes=vmem_limit),
    )(x_pad, W_all, b_all)

    # The kernel stores a lane-dense (.., 128) block; slice to the live hidden
    # channels for PyTorch-shape parity (keep 128 lanes for fused consumers).
    return out[..., :hidden_size]


def init_tcn_params(key, input_size, hidden_size, num_layers, kernel_size=3):
    """PyTorch-Conv1d-shaped parameters: per layer W (H, Cin, K), b (H,)."""
    params, dilations = [], []
    for i in range(num_layers):
        dilation = 2 ** i
        in_ch = input_size if i == 0 else hidden_size
        key, kw, kb = jax.random.split(key, 3)
        bound = float(in_ch * kernel_size) ** -0.5
        W = jax.random.uniform(kw, (hidden_size, in_ch, kernel_size),
                               jnp.float32, -bound, bound)
        b = jax.random.uniform(kb, (hidden_size,), jnp.float32, -bound, bound)
        params.append((W, b))
        dilations.append(dilation)
    return params, tuple(dilations)


def pack_tcn_params(params, lanes=LANES, tap_block=TAP_BLOCK):
    """Pack per-layer PyTorch weights into one (L, lanes, lanes) bf16 slab.

    Tap k's input channels occupy contraction rows [k*tap_block, k*tap_block+Cin);
    output channels occupy columns [0, H).  Requires max(Cin, H) <= tap_block and
    K * tap_block <= lanes so the packed-lane im2col is collision-free.
    """
    Ws, Bs = [], []
    for W_pt, b in params:                      # W_pt: (H, Cin, K)
        H, Cin, K = W_pt.shape
        assert K * tap_block <= lanes and max(Cin, H) <= tap_block
        Wk = jnp.zeros((lanes, lanes), jnp.float32)
        for k in range(K):
            Wk = Wk.at[k * tap_block:k * tap_block + Cin, :H].set(W_pt[:, :, k].T)
        Ws.append(Wk)
        Bs.append(jnp.pad(b, (0, lanes - H))[None, :])
    W_all = jnp.stack(Ws).astype(jnp.bfloat16)   # (L, lanes, lanes)
    b_all = jnp.stack(Bs).astype(jnp.float32)    # (L, 1, lanes)
    return W_all, b_all


def tcn_reference(x, params, dilations):
    """Pure-JAX f32 reference matching PyTorch Conv1d('same' pad) + ReLU stack."""
    h = x
    for (Wp, b), d in zip(params, dilations):
        H, Cin, K = Wp.shape
        pad = (K - 1) * d // 2
        B, T, _ = h.shape
        hp = jnp.pad(h, ((0, 0), (pad, pad), (0, 0)))
        acc = jnp.broadcast_to(b, (B, T, H)).astype(jnp.float32)
        for k in range(K):
            acc = acc + jnp.einsum('btc,hc->bth',
                                   hp[:, k * d:k * d + T, :], Wp[:, :, k])
        h = jnp.maximum(acc, 0.0)
    return h


if __name__ == "__main__":
    num_features = 10
    hidden_size = 32
    num_layers = 3
    kernel_size = 3
    B, T = 2, 16

    key = jax.random.PRNGKey(0)
    key, kx = jax.random.split(key)
    x = jax.random.normal(kx, (B, T, num_features), jnp.float32)

    params, dilations = init_tcn_params(
        key, num_features, hidden_size, num_layers, kernel_size)
    W_all, b_all = pack_tcn_params(params)

    out = tcn_forward(x, W_all, b_all, dilations, hidden_size, kernel_size)
    out = jax.block_until_ready(out)

    assert out.shape == (B, T, hidden_size), out.shape
    assert out.dtype == jnp.float32
    assert bool(jnp.all(out >= 0.0))  # ReLU output

    # Numerical check vs. f32 reference (kernel feeds bf16 to the MXU).
    ref = tcn_reference(x, params, dilations)
    max_err = float(jnp.max(jnp.abs(out - ref)))
    scale = float(jnp.max(jnp.abs(ref))) + 1e-6
    assert max_err / scale < 3e-2, (max_err, scale)

    print("KERNEL_OK")
</pallas_src>

<mosaic_0001>
module attributes {stable_mosaic.version = 11 : i64} {
  func.func @kernel(%arg0: i32, %arg1: memref<1x16x128xf32, #tpu.memory_space<vmem>>, %arg2: memref<3x128x128xbf16, #tpu.memory_space<vmem>>, %arg3: memref<3x1x128xf32, #tpu.memory_space<vmem>>, %arg4: memref<1x16x128xf32, #tpu.memory_space<vmem>>, %arg5: memref<1x48x128xbf16, #tpu.memory_space<vmem>>) attributes {dimension_semantics = [#tpu.dimension_semantics<parallel>], iteration_bounds = array<i64: 2>, scalar_prefetch = 0 : i64, scratch_operands = 1 : i64, tpu.core_type = #tpu.core_type<tc>, window_params = [{transform_indices = @transform_0, window_bounds = array<i64: 1, 16, 128>}, {pipeline_mode = #tpu.pipeline_mode<synchronous>, transform_indices = @transform_1, window_bounds = array<i64: 3, 128, 128>}, {pipeline_mode = #tpu.pipeline_mode<synchronous>, transform_indices = @transform_2, window_bounds = array<i64: 3, 1, 128>}, {transform_indices = @transform_3, window_bounds = array<i64: 1, 16, 128>}]} {
    %cst = arith.constant 0.000000e+00 : bf16
    %0 = vector.broadcast %cst : bf16 to vector<16x128xbf16>
    %c0 = arith.constant 0 : index
    %c0_0 = arith.constant 0 : index
    %c0_1 = arith.constant 0 : index
    %1 = vector.load %arg5[%c0, %c0_0, %c0_1] : memref<1x48x128xbf16, #tpu.memory_space<vmem>>, vector<1x16x128xbf16>
    %2 = vector.shape_cast %1 : vector<1x16x128xbf16> to vector<16x128xbf16>
    %3 = vector.shape_cast %0 : vector<16x128xbf16> to vector<1x16x128xbf16>
    tpu.vector_store %arg5[%c0, %c0_0, %c0_1], %3 {strides = array<i32>} : memref<1x48x128xbf16, #tpu.memory_space<vmem>>, vector<1x16x128xbf16>,
    %cst_2 = arith.constant 0.000000e+00 : bf16
    %4 = vector.broadcast %cst_2 : bf16 to vector<16x128xbf16>
    %c0_3 = arith.constant 0 : index
    %c32 = arith.constant 32 : index
    %c0_4 = arith.constant 0 : index
    %5 = vector.load %arg5[%c0_3, %c32, %c0_4] : memref<1x48x128xbf16, #tpu.memory_space<vmem>>, vector<1x16x128xbf16>
    %6 = vector.shape_cast %5 : vector<1x16x128xbf16> to vector<16x128xbf16>
    %7 = vector.shape_cast %4 : vector<16x128xbf16> to vector<1x16x128xbf16>
    tpu.vector_store %arg5[%c0_3, %c32, %c0_4], %7 {strides = array<i32>} : memref<1x48x128xbf16, #tpu.memory_space<vmem>>, vector<1x16x128xbf16>,
    %c0_5 = arith.constant 0 : index
    %c0_6 = arith.constant 0 : index
    %c0_7 = arith.constant 0 : index
    %8 = vector.load %arg1[%c0_5, %c0_6, %c0_7] : memref<1x16x128xf32, #tpu.memory_space<vmem>>, vector<1x16x128xf32>
    %9 = vector.shape_cast %8 : vector<1x16x128xf32> to vector<16x128xf32>
    %10 = arith.truncf %9 : vector<16x128xf32> to vector<16x128xbf16>
    %c0_8 = arith.constant 0 : index
    %c16 = arith.constant 16 : index
    %c0_9 = arith.constant 0 : index
    %11 = vector.load %arg5[%c0_8, %c16, %c0_9] : memref<1x48x128xbf16, #tpu.memory_space<vmem>>, vector<1x16x128xbf16>
    %12 = vector.shape_cast %11 : vector<1x16x128xbf16> to vector<16x128xbf16>
    %13 = vector.shape_cast %10 : vector<16x128xbf16> to vector<1x16x128xbf16>
    tpu.vector_store %arg5[%c0_8, %c16, %c0_9], %13 {strides = array<i32>} : memref<1x48x128xbf16, #tpu.memory_space<vmem>>, vector<1x16x128xbf16>,
    %c0_10 = arith.constant 0 : index
    %c15 = arith.constant 15 : index
    %c0_11 = arith.constant 0 : index
    %14 = vector.load %arg5[%c0_10, %c15, %c0_11] : memref<1x48x128xbf16, #tpu.memory_space<vmem>>, vector<1x16x128xbf16>
    %15 = vector.shape_cast %14 : vector<1x16x128xbf16> to vector<16x128xbf16>
    %c0_12 = arith.constant 0 : index
    %c16_13 = arith.constant 16 : index
    %c0_14 = arith.constant 0 : index
    %16 = vector.load %arg5[%c0_12, %c16_13, %c0_14] : memref<1x48x128xbf16, #tpu.memory_space<vmem>>, vector<1x16x128xbf16>
    %17 = vector.shape_cast %16 : vector<1x16x128xbf16> to vector<16x128xbf16>
    %18 = vector.extract_strided_slice %17 {offsets = [0, 96], sizes = [16, 32], strides = [1, 1]} : vector<16x128xbf16> to vector<16x32xbf16>
    %19 = vector.extract_strided_slice %17 {offsets = [0, 0], sizes = [16, 96], strides = [1, 1]} : vector<16x128xbf16> to vector<16x96xbf16>
    %20 = tpu.concatenate %18, %19 in 1 : vector<16x32xbf16>, vector<16x96xbf16> -> vector<16x128xbf16>
    %21 = arith.addf %15, %20 : vector<16x128xbf16>
    %c0_15 = arith.constant 0 : index
    %c17 = arith.constant 17 : index
    %c0_16 = arith.constant 0 : index
    %22 = vector.load %arg5[%c0_15, %c17, %c0_16] : memref<1x48x128xbf16, #tpu.memory_space<vmem>>, vector<1x16x128xbf16>
    %23 = vector.shape_cast %22 : vector<1x16x128xbf16> to vector<16x128xbf16>
    %24 = vector.extract_strided_slice %23 {offsets = [0, 64], sizes = [16, 64], strides = [1, 1]} : vector<16x128xbf16> to vector<16x64xbf16>
    %25 = vector.extract_strided_slice %23 {offsets = [0, 0], sizes = [16, 64], strides = [1, 1]} : vector<16x128xbf16> to vector<16x64xbf16>
    %26 = tpu.concatenate %24, %25 in 1 : vector<16x64xbf16>, vector<16x64xbf16> -> vector<16x128xbf16>
    %27 = arith.addf %21, %26 : vector<16x128xbf16>
    %c0_17 = arith.constant 0 : index
    %c0_18 = arith.constant 0 : index
    %c0_19 = arith.constant 0 : index
    %28 = vector.load %arg2[%c0_17, %c0_18, %c0_19] : memref<3x128x128xbf16, #tpu.memory_space<vmem>>, vector<1x128x128xbf16>
    %29 = vector.shape_cast %28 : vector<1x128x128xbf16> to vector<128x128xbf16>
    %cst_20 = arith.constant dense<0.000000e+00> : vector<16x128xf32>
    %30 = tpu.matmul %27, %29, %cst_20 {dimension_numbers = #tpu.dot_dimension_numbers<[1], [0], [0], [1], [0, 0, 1, 1], [], []>} : vector<16x128xbf16>, vector<128x128xbf16>, vector<16x128xf32> -> vector<16x128xf32>
    %c0_21 = arith.constant 0 : index
    %c0_22 = arith.constant 0 : index
    %c0_23 = arith.constant 0 : index
    %31 = vector.load %arg3[%c0_21, %c0_22, %c0_23] : memref<3x1x128xf32, #tpu.memory_space<vmem>>, vector<1x1x128xf32>
    %32 = vector.shape_cast %31 : vector<1x1x128xf32> to vector<1x128xf32>
    %33 = vector.broadcast %32 : vector<1x128xf32> to vector<16x128xf32>
    %34 = arith.addf %30, %33 : vector<16x128xf32>
    %cst_24 = arith.constant 0.000000e+00 : f32
    %35 = vector.broadcast %cst_24 : f32 to vector<16x128xf32>
    %36 = arith.maximumf %34, %35 : vector<16x128xf32>
    %37 = arith.truncf %36 : vector<16x128xf32> to vector<16x128xbf16>
    %38 = vector.shape_cast %37 : vector<16x128xbf16> to vector<1x16x128xbf16>
    %39 = vector.shape_cast %38 : vector<1x16x128xbf16> to vector<16x128xbf16>
    %c0_25 = arith.constant 0 : index
    %c16_26 = arith.constant 16 : index
    %c0_27 = arith.constant 0 : index
    %40 = vector.load %arg5[%c0_25, %c16_26, %c0_27] : memref<1x48x128xbf16, #tpu.memory_space<vmem>>, vector<1x16x128xbf16>
    %41 = vector.shape_cast %40 : vector<1x16x128xbf16> to vector<16x128xbf16>
    %42 = vector.shape_cast %39 : vector<16x128xbf16> to vector<1x16x128xbf16>
    tpu.vector_store %arg5[%c0_25, %c16_26, %c0_27], %42 {strides = array<i32>} : memref<1x48x128xbf16, #tpu.memory_space<vmem>>, vector<1x16x128xbf16>,
    %c0_28 = arith.constant 0 : index
    %c14 = arith.constant 14 : index
    %c0_29 = arith.constant 0 : index
    %43 = vector.load %arg5[%c0_28, %c14, %c0_29] : memref<1x48x128xbf16, #tpu.memory_space<vmem>>, vector<1x16x128xbf16>
    %44 = vector.shape_cast %43 : vector<1x16x128xbf16> to vector<16x128xbf16>
    %c0_30 = arith.constant 0 : index
    %c16_31 = arith.constant 16 : index
    %c0_32 = arith.constant 0 : index
    %45 = vector.load %arg5[%c0_30, %c16_31, %c0_32] : memref<1x48x128xbf16, #tpu.memory_space<vmem>>, vector<1x16x128xbf16>
    %46 = vector.shape_cast %45 : vector<1x16x128xbf16> to vector<16x128xbf16>
    %47 = vector.extract_strided_slice %46 {offsets = [0, 96], sizes = [16, 32], strides = [1, 1]} : vector<16x128xbf16> to vector<16x32xbf16>
    %48 = vector.extract_strided_slice %46 {offsets = [0, 0], sizes = [16, 96], strides = [1, 1]} : vector<16x128xbf16> to vector<16x96xbf16>
    %49 = tpu.concatenate %47, %48 in 1 : vector<16x32xbf16>, vector<16x96xbf16> -> vector<16x128xbf16>
    %50 = arith.addf %44, %49 : vector<16x128xbf16>
    %c0_33 = arith.constant 0 : index
    %c18 = arith.constant 18 : index
    %c0_34 = arith.constant 0 : index
    %51 = vector.load %arg5[%c0_33, %c18, %c0_34] : memref<1x48x128xbf16, #tpu.memory_space<vmem>>, vector<1x16x128xbf16>
    %52 = vector.shape_cast %51 : vector<1x16x128xbf16> to vector<16x128xbf16>
    %53 = vector.extract_strided_slice %52 {offsets = [0, 64], sizes = [16, 64], strides = [1, 1]} : vector<16x128xbf16> to vector<16x64xbf16>
    %54 = vector.extract_strided_slice %52 {offsets = [0, 0], sizes = [16, 64], strides = [1, 1]} : vector<16x128xbf16> to vector<16x64xbf16>
    %55 = tpu.concatenate %53, %54 in 1 : vector<16x64xbf16>, vector<16x64xbf16> -> vector<16x128xbf16>
    %56 = arith.addf %50, %55 : vector<16x128xbf16>
    %c1 = arith.constant 1 : index
    %c0_35 = arith.constant 0 : index
    %c0_36 = arith.constant 0 : index
    %57 = vector.load %arg2[%c1, %c0_35, %c0_36] : memref<3x128x128xbf16, #tpu.memory_space<vmem>>, vector<1x128x128xbf16>
    %58 = vector.shape_cast %57 : vector<1x128x128xbf16> to vector<128x128xbf16>
    %cst_37 = arith.constant dense<0.000000e+00> : vector<16x128xf32>
    %59 = tpu.matmul %56, %58, %cst_37 {dimension_numbers = #tpu.dot_dimension_numbers<[1], [0], [0], [1], [0, 0, 1, 1], [], []>} : vector<16x128xbf16>, vector<128x128xbf16>, vector<16x128xf32> -> vector<16x128xf32>
    %c1_38 = arith.constant 1 : index
    %c0_39 = arith.constant 0 : index
    %c0_40 = arith.constant 0 : index
    %60 = vector.load %arg3[%c1_38, %c0_39, %c0_40] : memref<3x1x128xf32, #tpu.memory_space<vmem>>, vector<1x1x128xf32>
    %61 = vector.shape_cast %60 : vector<1x1x128xf32> to vector<1x128xf32>
    %62 = vector.broadcast %61 : vector<1x128xf32> to vector<16x128xf32>
    %63 = arith.addf %59, %62 : vector<16x128xf32>
    %cst_41 = arith.constant 0.000000e+00 : f32
    %64 = vector.broadcast %cst_41 : f32 to vector<16x128xf32>
    %65 = arith.maximumf %63, %64 : vector<16x128xf32>
    %66 = arith.truncf %65 : vector<16x128xf32> to vector<16x128xbf16>
    %67 = vector.shape_cast %66 : vector<16x128xbf16> to vector<1x16x128xbf16>
    %68 = vector.shape_cast %67 : vector<1x16x128xbf16> to vector<16x128xbf16>
    %c0_42 = arith.constant 0 : index
    %c16_43 = arith.constant 16 : index
    %c0_44 = arith.constant 0 : index
    %69 = vector.load %arg5[%c0_42, %c16_43, %c0_44] : memref<1x48x128xbf16, #tpu.memory_space<vmem>>, vector<1x16x128xbf16>
    %70 = vector.shape_cast %69 : vector<1x16x128xbf16> to vector<16x128xbf16>
    %71 = vector.shape_cast %68 : vector<16x128xbf16> to vector<1x16x128xbf16>
    tpu.vector_store %arg5[%c0_42, %c16_43, %c0_44], %71 {strides = array<i32>} : memref<1x48x128xbf16, #tpu.memory_space<vmem>>, vector<1x16x128xbf16>,
    %c0_45 = arith.constant 0 : index
    %c12 = arith.constant 12 : index
    %c0_46 = arith.constant 0 : index
    %72 = vector.load %arg5[%c0_45, %c12, %c0_46] : memref<1x48x128xbf16, #tpu.memory_space<vmem>>, vector<1x16x128xbf16>
    %73 = vector.shape_cast %72 : vector<1x16x128xbf16> to vector<16x128xbf16>
    %c0_47 = arith.constant 0 : index
    %c16_48 = arith.constant 16 : index
    %c0_49 = arith.constant 0 : index
    %74 = vector.load %arg5[%c0_47, %c16_48, %c0_49] : memref<1x48x128xbf16, #tpu.memory_space<vmem>>, vector<1x16x128xbf16>
    %75 = vector.shape_cast %74 : vector<1x16x128xbf16> to vector<16x128xbf16>
    %76 = vector.extract_strided_slice %75 {offsets = [0, 96], sizes = [16, 32], strides = [1, 1]} : vector<16x128xbf16> to vector<16x32xbf16>
    %77 = vector.extract_strided_slice %75 {offsets = [0, 0], sizes = [16, 96], strides = [1, 1]} : vector<16x128xbf16> to vector<16x96xbf16>
    %78 = tpu.concatenate %76, %77 in 1 : vector<16x32xbf16>, vector<16x96xbf16> -> vector<16x128xbf16>
    %79 = arith.addf %73, %78 : vector<16x128xbf16>
    %c0_50 = arith.constant 0 : index
    %c20 = arith.constant 20 : index
    %c0_51 = arith.constant 0 : index
    %80 = vector.load %arg5[%c0_50, %c20, %c0_51] : memref<1x48x128xbf16, #tpu.memory_space<vmem>>, vector<1x16x128xbf16>
    %81 = vector.shape_cast %80 : vector<1x16x128xbf16> to vector<16x128xbf16>
    %82 = vector.extract_strided_slice %81 {offsets = [0, 64], sizes = [16, 64], strides = [1, 1]} : vector<16x128xbf16> to vector<16x64xbf16>
    %83 = vector.extract_strided_slice %81 {offsets = [0, 0], sizes = [16, 64], strides = [1, 1]} : vector<16x128xbf16> to vector<16x64xbf16>
    %84 = tpu.concatenate %82, %83 in 1 : vector<16x64xbf16>, vector<16x64xbf16> -> vector<16x128xbf16>
    %85 = arith.addf %79, %84 : vector<16x128xbf16>
    %c2 = arith.constant 2 : index
    %c0_52 = arith.constant 0 : index
    %c0_53 = arith.constant 0 : index
    %86 = vector.load %arg2[%c2, %c0_52, %c0_53] : memref<3x128x128xbf16, #tpu.memory_space<vmem>>, vector<1x128x128xbf16>
    %87 = vector.shape_cast %86 : vector<1x128x128xbf16> to vector<128x128xbf16>
    %cst_54 = arith.constant dense<0.000000e+00> : vector<16x128xf32>
    %88 = tpu.matmul %85, %87, %cst_54 {dimension_numbers = #tpu.dot_dimension_numbers<[1], [0], [0], [1], [0, 0, 1, 1], [], []>} : vector<16x128xbf16>, vector<128x128xbf16>, vector<16x128xf32> -> vector<16x128xf32>
    %c2_55 = arith.constant 2 : index
    %c0_56 = arith.constant 0 : index
    %c0_57 = arith.constant 0 : index
    %89 = vector.load %arg3[%c2_55, %c0_56, %c0_57] : memref<3x1x128xf32, #tpu.memory_space<vmem>>, vector<1x1x128xf32>
    %90 = vector.shape_cast %89 : vector<1x1x128xf32> to vector<1x128xf32>
    %91 = vector.broadcast %90 : vector<1x128xf32> to vector<16x128xf32>
    %92 = arith.addf %88, %91 : vector<16x128xf32>
    %cst_58 = arith.constant 0.000000e+00 : f32
    %93 = vector.broadcast %cst_58 : f32 to vector<16x128xf32>
    %94 = arith.maximumf %92, %93 : vector<16x128xf32>
    %95 = vector.shape_cast %94 : vector<16x128xf32> to vector<1x16x128xf32>
    %c0_59 = arith.constant 0 : index
    %c0_60 = arith.constant 0 : index
    %c0_61 = arith.constant 0 : index
    %96 = vector.load %arg4[%c0_59, %c0_60, %c0_61] : memref<1x16x128xf32, #tpu.memory_space<vmem>>, vector<1x16x128xf32>
    tpu.vector_store %arg4[%c0_59, %c0_60, %c0_61], %95 {strides = array<i32>} : memref<1x16x128xf32, #tpu.memory_space<vmem>>, vector<1x16x128xf32>,
    return
  }
  func.func @transform_0(%arg0: i32) -> (i32, i32, i32) {
    %c0_i32 = arith.constant 0 : i32
    %c0_i32_0 = arith.constant 0 : i32
    %c0_i32_1 = arith.constant 0 : i32
    return %arg0, %c0_i32, %c0_i32_0 : i32, i32, i32
  }
  func.func @transform_1(%arg0: i32) -> (i32, i32, i32) {
    %c0_i32 = arith.constant 0 : i32
    %c0_i32_0 = arith.constant 0 : i32
    %c0_i32_1 = arith.constant 0 : i32
    %c0_i32_2 = arith.constant 0 : i32
    return %c0_i32, %c0_i32_0, %c0_i32_1 : i32, i32, i32
  }
  func.func @transform_2(%arg0: i32) -> (i32, i32, i32) {
    %c0_i32 = arith.constant 0 : i32
    %c0_i32_0 = arith.constant 0 : i32
    %c0_i32_1 = arith.constant 0 : i32
    %c0_i32_2 = arith.constant 0 : i32
    return %c0_i32, %c0_i32_0, %c0_i32_1 : i32, i32, i32
  }
  func.func @transform_3(%arg0: i32) -> (i32, i32, i32) {
    %c0_i32 = arith.constant 0 : i32
    %c0_i32_0 = arith.constant 0 : i32
    %c0_i32_1 = arith.constant 0 : i32
    return %arg0, %c0_i32, %c0_i32_0 : i32, i32, i32
  }
}

</mosaic_0001>

<bundles_post_ra>
// kernel: tcn_forward.1
= control target key start
LH: loop header
LB: loop body
LE: loop exit
PB: predicated region body
PF: predicated region fallthrough
CT: control target
= control target key end

     0   :  { %8 = vsyncpa [#allocation4], 0  ;;  %s1287_s0 = inlined_call_operand.vmem [shape: f32[2,16,128], index: 0, kind: input, shape index: {}]   ;;  %s1288_s1 = inlined_call_operand.hbm [shape: bf16[3,128,128], index: 1, kind: input, shape index: {}]   ;;  %s1289_s2 = inlined_call_operand.vmem [shape: f32[3,1,128], index: 2, kind: input, shape index: {}]   ;;  %s1290_s3 = inlined_call_operand.hbm [shape: f32[2,16,128], index: 3, kind: output, shape index: {}]  }
   0x1   :  { %9 = vsyncpa [#allocation5], 0 }
   0x2   :  { %11 = vsyncpa [#allocation5 + $0x1], 0  ;;  %s1101_s12 = smov 0   ;;  %s1103_s13 = smov 0  }
   0x3   :  { %s1105_s14 = smov 0   ;;  %s1107_s15 = smov 0  }
   0x4 LB: > { %s1122_s16 = sadd.s32 4294967295, %s1068_s15   ;;  %s759_s17 = sadd.s32 4294967294, %s1068_s15   ;;  %s1068_s15 = sphi %s1107_s15, %s1306_s15   ;;  %s1064_s14 = sphi %s1105_s14, %s1305_s14   ;;  %s1060_s13 = sphi %s1103_s13, %s1304_s13   ;;  %s1056_s12 = sphi %s1101_s12, %s1303_s12  }
   0x5   : > { %s1126_s18 = sadd.s32 1, %s1068_s15   ;;  %s92_s19 = sadd.s32 1, %s1064_s14 }
   0x6   : > { %s89_s20 = ssub.s32 %s1068_s15, %s1126_s18  ;;  %p102_p0 = scmp.ne.s32.totalorder %s1064_s14, %s1060_s13 }
   0x7   : > { %p90_p1 = scmp.eq.s32.totalorder %s89_s20, 0  ;;  %p103_p2 = scmp.eq.s32.totalorder %s1122_s16, 1 }
   0x8   : > { %p108_p3 = scmp.ne.s32.totalorder %s1060_s13, %s1056_s12  ;;  %p109_p4 = scmp.eq.s32.totalorder %s759_s17, 1 }
   0x9   : > { %s1137_s21 = scalar_select %p90_p1, %s1064_s14, %s92_s19  }
   0xa   : > { %p1139_p5 = por %p103_p2, %p102_p0  ;;  %p1143_p6 = por %p109_p4, %p108_p3 }
   0xb   : > { %p760_p7 = scmp.ge.s32.totalorder %s1068_s15, 1  ;;  %p116_p8 = scmp.lt.s32.totalorder %s1068_s15, 3 }
   0xc   : > { %s1294_s22 = scalar_select %p1139_p5, 1, 0 }
   0xd   : > { %s1295_s23 = scalar_select %p1143_p6, 1, 0 }
   0xe   : > { %p1291_p9 = scmp.eq.s32.totalorder %s1122_s16, 0  ;;  %p1150_p10 = pnand %p760_p7, %p116_p8 }
   0xf   : > { %s1070_s25 = smov [#allocation3]   ;;  %s974_s30 = scalar_lea.hbm %s1288_s1, 3072 }
  0x10   : > { %s1296_s24 = scalar_select %p1150_p10, 1, 0 }
  0x11   : > { %s128_s26 = sshll.u32 %s1070_s25, 4  ;;  %p897_p11 = pneg %p1150_p10  ;;  %s129_s26 = int_to_ptr.vmem [resolvable:$true] %s128_s26 }
  0x12   : > { %p975_p13 = scmp.ne.s32.totalorder %s1288_s1, %s974_s30  ;;  %p981_p3 = scmp.lt.u32.totalorder %s974_s30, %s1288_s1 }
  0x13   : > { %p1158_p12 = pnand %p1291_p9, %p897_p11 }
  0x15   : > { %p976_p0 = pneg %p1158_p12 }
  0x17   : > { %p977_p1 = pnand %p976_p0, %p975_p13 }
  0x19   : > { %p978_p2 = pneg %p977_p1 }
  0x1b   : > { %p983_p4 = pnand %p981_p3, %p978_p2 }
  0x1d   : > { %986 = shalt.err (!%p983_p4)
}
  0x1e   : > { %s987_s8 = scalar_lea.vmem %s129_s26, 3072  ;;  %p995_p9 = scmp.lt.s32.totalorder %s129_s26, %s129_s26 }
  0x1f   : > { %p988_p7 = scmp.ne.s32.totalorder %s129_s26, %s987_s8  ;;  %p996_p6 = scmp.lt.s32.totalorder %s987_s8, %s987_s8 }
  0x21   : > { %p990_p8 = pnand %p988_p7, %p976_p0  ;;  %p997_p5 = por %p996_p6, %p995_p9 }
  0x23   : > { %p991_p11 = pneg %p990_p8 }
  0x25   : > { %p998_p10 = pnand %p997_p5, %p991_p11 }
  0x27   : > { %1001 = shalt.err (!%p998_p10)
}
  0x28   : > { %s1071_s9 = smov 64   ;;  %s1072_s10 = smov 4  }
  0x29   : > { %900 = dma.hbm_to_vmem [thread:$0]  (!%p1158_p12), %s1288_s1, 3072, %s129_s26, [#allocation4], %s1071_s9, %s1071_s9, %s1072_s10  }
  0x2a   : > { %p1298_p13 = scmp.ne.s32.totalorder %s1296_s24, 0 }
  0x2b   : > { %p1299_p1 = scmp.eq.s32.totalorder (!%p1298_p13), %s1122_s16, 0 }
  0x2c   : > { %155 = sbr.rel (%p1298_p13) target bundleno = 1128 (0x468), region = 32 }
  0x33   : > { %1047 = dma.done.wait (%p1299_p1), [#allocation4], 3072   ;;  %p1300_p0 = pmov %p1299_p1 }
  0x34   : > { %p179_p5 = scmp.lt.s32.totalorder %s1122_s16, 1  ;;  %v1073_v0 = vmov 0   ;;  %v1074_v1 = vmov 0.0   ;;  %v950_v6 = vld [vmem:[#allocation3] sm:$0xff]   ;;  %vm1075_vm0 = vmmov 0   ;;  %s1076_s27 = smov 64  }
  0x35   : > { %1049 = vsyncadd (%p1300_p0), [#allocation4], 4294964224  ;;  %186 = vst [vmem:[#allocation2 + $0x10] sm:$0xff] %v1073_v0  ;;  %831 = vmatprep.subr.bf16.mxu0 %v1074_v1  ;;  %851 = vmatprep.subr.bf16.mxu1 %v1074_v1  ;;  %s1077_s28 = smov 32   ;;  %v951_v7 = vld [vmem:[#allocation3 + $0x8] sm:$0xff]   ;;  %v952_v8 = vld [vmem:[#allocation3 + $0x10] sm:$0xff]  }
  0x36   : > { %185 = vst [vmem:[#allocation2] sm:$0xff] %v1073_v0  ;;  %s180_s19 = scalar_select %p179_p5, %s1122_s16, 1  ;;  %847 = vmatprep.mubr.msk.bf16.mxu0 %vm1075_vm0, %v1074_v1  ;;  %867 = vmatprep.mubr.msk.bf16.mxu1 %vm1075_vm0, %v1074_v1  ;;  %v953_v9 = vld [vmem:[#allocation3 + $0x18] sm:$0xff]   ;;  %v954_v10 = vld [vmem:[#allocation3 + $0x20] sm:$0xff]   ;;  %v955_v11 = vld [vmem:[#allocation3 + $0x28] sm:$0xff]   ;;  %vm219_vm1 = vcmask 1046528  }
  0x37   : > { %832 = vmatpush3.bf16.msra.mxu0 %v950_v6  ;;  %v956_v12 = vld [vmem:[#allocation3 + $0x30] sm:$0xff]   ;;  %v957_v13 = vld [vmem:[#allocation3 + $0x38] sm:$0xff]   ;;  %vm250_vm2 = vsmask.f32 256  ;;  %v958_v36 = vld [vmem:[#allocation3 + $0x40] sm:$0xff]   ;;  %vm381_vm3 = vcmask 1045504  }
  0x38   : > { %s802_s20 = sshll.u32 %s180_s19, 4  ;;  %833 = vmatprep.subr.bf16.mxu0 %v1074_v1  ;;  %852 = vmatpush3.bf16.msra.mxu1 %v958_v36  ;;  %v959_v37 = vld [vmem:[#allocation3 + $0x48] sm:$0xff]   ;;  %v960_v38 = vld [vmem:[#allocation3 + $0x50] sm:$0xff]   ;;  %v961_v39 = vld [vmem:[#allocation3 + $0x58] sm:$0xff]   ;;  %vm416_vm4 = vcmask 1040384   ;;  %vm538_vm5 = vcmask 1043456  }
  0x39   : > { %s183_s26 = scalar_lea.vmem %s1287_s0, %s802_s20  ;;  %853 = vmatprep.subr.bf16.mxu1 %v1074_v1  ;;  %v962_v40 = vld [vmem:[#allocation3 + $0x60] sm:$0xff]   ;;  %v768_v41 = vld [vmem:[%s1289_s2] ss:$0 sm:$0xff]  ;;  %v964_v49 = vld [vmem:[#allocation3 + $0x70] sm:$0xff]   ;;  %vm573_vm6 = vcmask 1041408   ;;  %s176_s6 = sand.u32 1, %s1060_s13  }
  0x3a   : > { %v187_v2 = vld [vmem:[%s183_s26] sm:$0xff]  ;;  %v188_v3 = vld [vmem:[%s183_s26 + $0x8] sm:$0xff]  ;;  %v965_v53 = vld [vmem:[#allocation3 + $0x78] sm:$0xff]   ;;  %s765_s7 = sshll.u32 %s176_s6, 4  ;;  %s803_s17 = sshll.u32 %s1122_s16, 8 }
  0x3b   : > { %v189_v4 = vpack.c.bf16 %v188_v3, %v187_v2  ;;  %834 = vmatpush3.bf16.msra.mxu0 %v951_v7  ;;  %v963_v42 = vld [vmem:[#allocation3 + $0x68] sm:$0xff]   ;;  %s178_s10 = scalar_lea.vmem [#allocation6], %s765_s7  ;;  %s1244_s24 = scalar_lea.hbm %s1290_s3, %s803_s17 }
  0x3c   : > { %v208_v5 = vld [vmem:[#allocation2 + $0x10] sm:$0x1]  ;;  %835 = vmatprep.subr.bf16.mxu0 %v1074_v1  ;;  %854 = vmatpush3.bf16.msra.mxu1 %v959_v37  ;;  %s685_s11 = sshll.u32 %s178_s10, 4  ;;  %s1246_s25 = scalar_lea.sflag [#allocation5], %s176_s6  ;;  %s1239_s11 = int_to_ptr.vmem [resolvable:$true] %s685_s11 }
  0x3d   : > { %213 = vrot.lane.b32.xlu1 %v208_v5, %s1076_s27  ;;  %194 = vrot.lane.b32.xlu0 %v189_v4, %s1077_s28  ;;  %v191_v17 = vld [vmem:[#allocation2] sm:$0x80]  ;;  %v370_v54 = vld [vmem:[#allocation2 + $0x10] sm:$0x1]  ;;  %s1002_s16 = scalar_lea.vmem %s1239_s11, 256  ;;  %p1301_p9 = scmp.ne.s32.totalorder %s1294_s22, 0 }
  0x3e   : > { %855 = vmatprep.subr.bf16.mxu1 %v1074_v1  ;;  %v357_v59 = vld [vmem:[#allocation2] sm:$0x80]  ;;  %p1003_p6 = scmp.ne.s32.totalorder %s1239_s11, %s1002_s16  ;;  %s1078_s26 = smov [#allocation6]  }
  0x3f   : > { %836 = vmatpush3.bf16.msra.mxu0 %v952_v8 }
  0x40   : > { %837 = vmatprep.subr.bf16.mxu0 %v1074_v1  ;;  %856 = vmatpush3.bf16.msra.mxu1 %v960_v38  ;;  %p1004_p10 = pnand %p1003_p6, %p1301_p9 }
  0x41   : > { %211 = vrot.lane.b32.xlu0 %v189_v4, %s1076_s27  ;;  %857 = vmatprep.subr.bf16.mxu1 %v1074_v1 }
  0x42   : > { %p1005_p12 = pneg %p1004_p10 }
  0x43   : > { %838 = vmatpush3.bf16.msra.mxu0 %v953_v9  ;;  %v966_v9 = vld [vmem:[#allocation3 + $0x80] sm:$0xff]  }
  0x44   : > { %839 = vmatprep.subr.bf16.mxu0 %v1074_v1  ;;  %858 = vmatpush3.bf16.msra.mxu1 %v961_v39 }
  0x45   : > { %859 = vmatprep.subr.bf16.mxu1 %v1074_v1 }
  0x47   : > { %840 = vmatpush3.bf16.msra.mxu0 %v954_v10  ;;  %v967_v10 = vld [vmem:[#allocation3 + $0x88] sm:$0xff]  }
  0x48   : > { %841 = vmatprep.subr.bf16.mxu0 %v1074_v1  ;;  %860 = vmatpush3.bf16.msra.mxu1 %v962_v40 }
  0x49   : > { %861 = vmatprep.subr.bf16.mxu1 %v1074_v1 }
  0x4b   : > { %842 = vmatpush3.bf16.msra.mxu0 %v955_v11  ;;  %v968_v11 = vld [vmem:[#allocation3 + $0x90] sm:$0xff]  }
  0x4c   : > { %843 = vmatprep.subr.bf16.mxu0 %v1074_v1  ;;  %862 = vmatpush3.bf16.msra.mxu1 %v963_v42 }
  0x4d   : > { %863 = vmatprep.subr.bf16.mxu1 %v1074_v1 }
  0x4f   : > { %844 = vmatpush3.bf16.msra.mxu0 %v956_v12  ;;  %v969_v12 = vld [vmem:[#allocation3 + $0x98] sm:$0xff]  }
  0x50   : > { %845 = vmatprep.subr.bf16.mxu0 %v1074_v1  ;;  %864 = vmatpush3.bf16.msra.mxu1 %v964_v49 }
  0x51   : > { %865 = vmatprep.subr.bf16.mxu1 %v1074_v1 }
  0x53   : > { %846 = vmatpush3.bf16.msra.mxu0 %v957_v13  ;;  %v970_v13 = vld [vmem:[#allocation3 + $0xa0] sm:$0xff]  }
  0x54   : > { %871 = vmatprep.subr.bf16.mxu0 %v1074_v1  ;;  %866 = vmatpush3.bf16.msra.mxu1 %v965_v53 }
  0xaf   : > { %v195_v14 = vpop.permute.xlu0 %194  ;;  %v214_v15 = vpop.permute.xlu1 %213 }
  0xb0   : > { %v197_v16 = vshll.u32 %v195_v14, 16  ;;  %v200_v19 = vshrl.u32 %v195_v14, 16  ;;  %v221_v20 = vrot.slane %v214_v15, 1  ;;  %v778_v14 = vld [vmem:[%s1289_s2 + $0x1] ss:$0 sm:$0xff] }
  0xb1   : > { %v971_v15 = vld [vmem:[#allocation3 + $0xa8] sm:$0xff]  }
  0xb2   : > { %v199_v18 = vrot.slane %v197_v16, 1 }
  0xb3   : > { %v212_v21 = vpop.permute.xlu0 %211 }
  0xb4   : > { %v202_v22 = vor.u32 %v200_v19, %v199_v18  ;;  %v205_v23 = vadd.bf16 %v199_v18, %v191_v17  ;;  %v220_v24 = vrot.slane %v212_v21, 1 }
  0xb6   : > { %v206_v25 = vadd.bf16 %v202_v22, %v189_v4  ;;  %v225_v26 = vadd.bf16 %v220_v24, %v205_v23  ;;  %v222_v27 = vsel %vm219_vm1, %v220_v24, %v221_v20  ;;  %v972_v22 = vld [vmem:[#allocation3 + $0xb0] sm:$0xff]  }
  0xb8   : > { %v226_v28 = vadd.bf16 %v222_v27, %v206_v25  ;;  %v252_v29 = vshrl.u32 %v225_v26, 16  ;;  %v973_v26 = vld [vmem:[#allocation3 + $0xb8] sm:$0xff]  }
  0xb9   : > { %v527_v27 = vld [vmem:[#allocation2 + $0x10] sm:$0x3] }
  0xba   : > { %v256_v30 = vshrl.u32 %v226_v28, 16  ;;  %v259_v31 = vshll.u32 %v226_v28, 16  ;;  %v254_v33 = vrot.slane %v252_v29, 7 }
  0xbc   : > { %v258_v32 = vrot.slane %v256_v30, 7 }
  0xbe   : > { %v261_v34 = vor.u32 %v259_v31, %v258_v32  ;;  %v514_v32 = vld [vmem:[#allocation2] sm:$0xc0] }
  0xc0   : > { %v262_v35 = vsel %vm250_vm2, %v254_v33, %v261_v34 }
  0xc1   : > { %848 = vmatmul.mubr.bf16.vlgmr.msra.gmra.mrb[0].mxu0 %v262_v35 }
  0xc2   : > { %887 = vmatprep.mubr.msk.bf16.mxu0 %vm1075_vm0, %v1074_v1  ;;  %872 = vmatpush3.bf16.msra.mxu0 %v966_v9 }
  0xc3   : > { %873 = vmatprep.subr.bf16.mxu0 %v1074_v1 }
  0xc6   : > { %874 = vmatpush3.bf16.msra.mxu0 %v967_v10 }
  0xc7   : > { %875 = vmatprep.subr.bf16.mxu0 %v1074_v1 }
  0xca   : > { %876 = vmatpush3.bf16.msra.mxu0 %v968_v11 }
  0xcb   : > { %877 = vmatprep.subr.bf16.mxu0 %v1074_v1 }
  0xce   : > { %878 = vmatpush3.bf16.msra.mxu0 %v969_v12 }
  0xcf   : > { %879 = vmatprep.subr.bf16.mxu0 %v1074_v1 }
  0xd2   : > { %880 = vmatpush3.bf16.msra.mxu0 %v970_v13 }
  0xd3   : > { %881 = vmatprep.subr.bf16.mxu0 %v1074_v1 }
  0xd6   : > { %882 = vmatpush3.bf16.msra.mxu0 %v971_v15 }
  0xd7   : > { %883 = vmatprep.subr.bf16.mxu0 %v1074_v1 }
  0xda   : > { %884 = vmatpush3.bf16.msra.mxu0 %v972_v22 }
  0xdb   : > { %885 = vmatprep.subr.bf16.mxu0 %v1074_v1 }
  0xde   : > { %886 = vmatpush3.bf16.msra.mxu0 %v973_v26 }
 0x194   : > { %v346_v43 = vpop.f32.mrb[0].mxu0 }
 0x195   : > { %v347_v44 = vadd.f32 %v768_v41, %v346_v43  ;;  %v849_v45 = vpop.f32.mrb[1].mxu0 }
 0x196   : > { %v349_v46 = vpop.f32.mrb[2].mxu0 }
 0x197   : > { %v350_v47 = vadd.f32 %v768_v41, %v349_v46  ;;  %v850_v48 = vpop.f32.mrb[3].mxu0  ;;  %v353_v50 = vmax.f32 %v347_v44, 0.0  ;;  %v788_v44 = vld [vmem:[%s1289_s2 + $0x2] ss:$0 sm:$0xff] }
 0x199   : > { %v354_v51 = vmax.f32 %v350_v47, 0.0 }
 0x19b   : > { %v355_v52 = vpack.c.bf16 %v354_v51, %v353_v50 }
 0x19d   : > { %356 = vst [vmem:[#allocation2 + $0x8] sm:$0xff] %v355_v52  ;;  %361 = vrot.lane.b32.xlu1 %v355_v52, %s1077_s28 }
 0x1a1   : > { %375 = vrot.lane.b32.xlu1 %v370_v54, %s1076_s27 }
 0x1a4   : > { %v369_v55 = vld [vmem:[#allocation2 + $0x8] sm:$0xfe] }
 0x1a5   : > { %373 = vrot.lane.b32.xlu0 %v369_v55, %s1076_s27  ;;  %v358_v63 = vld [vmem:[#allocation2 + $0x8] sm:$0x7f] }
 0x20f   : > { %v362_v56 = vpop.permute.xlu1 %361 }
 0x210   : > { %v365_v58 = vrot.slane %v362_v56, 1 }
 0x212   : > { %v367_v0 = vadd.bf16 %v365_v58, %v357_v59  ;;  %v368_v2 = vadd.bf16 %v365_v58, %v358_v63 }
 0x213   : > { %v376_v57 = vpop.permute.xlu1 %375 }
 0x214   : > { %v383_v60 = vrot.slane %v376_v57, 2 }
 0x217   : > { %v374_v61 = vpop.permute.xlu0 %373 }
 0x218   : > { %v382_v62 = vrot.slane %v374_v61, 2 }
 0x21a   : > { %v387_v3 = vadd.bf16 %v382_v62, %v367_v0  ;;  %v384_v4 = vsel %vm381_vm3, %v382_v62, %v383_v60 }
 0x21b   : > { %v388_v5 = vadd.bf16 %v384_v4, %v368_v2 }
 0x21c   : > { %v417_v6 = vrot.slane %v387_v3, 7 }
 0x21d   : > { %v418_v7 = vrot.slane %v388_v5, 7 }
 0x21f   : > { %v419_v8 = vsel %vm416_vm4, %v417_v6, %v418_v7 }
 0x220   : > { %868 = vmatmul.mubr.bf16.vlgmr.msra.gmra.mrb[0].mxu1 %v419_v8 }
 0x2f3   : > { %v503_v16 = vpop.f32.mrb[0].mxu1 }
 0x2f4   : > { %v504_v17 = vadd.f32 %v778_v14, %v503_v16  ;;  %v869_v18 = vpop.f32.mrb[1].mxu1 }
 0x2f5   : > { %v506_v19 = vpop.f32.mrb[2].mxu1 }
 0x2f6   : > { %v507_v20 = vadd.f32 %v778_v14, %v506_v19  ;;  %v870_v21 = vpop.f32.mrb[3].mxu1  ;;  %v510_v23 = vmax.f32 %v504_v17, 0.0 }
 0x2f8   : > { %v511_v24 = vmax.f32 %v507_v20, 0.0 }
 0x2fa   : > { %v512_v25 = vpack.c.bf16 %v511_v24, %v510_v23 }
 0x2fc   : > { %513 = vst [vmem:[#allocation2 + $0x8] sm:$0xff] %v512_v25  ;;  %518 = vrot.lane.b32.xlu0 %v512_v25, %s1077_s28 }
 0x300   : > { %532 = vrot.lane.b32.xlu0 %v527_v27, %s1076_s27 }
 0x303   : > { %v526_v28 = vld [vmem:[#allocation2 + $0x8] sm:$0xfc] }
 0x304   : > { %530 = vrot.lane.b32.xlu1 %v526_v28, %s1076_s27  ;;  %v515_v35 = vld [vmem:[#allocation2 + $0x8] sm:$0x3f]  ;;  %s1006_s27 = sshll.u32 %s1078_s26, 4  ;;  %s1007_s27 = int_to_ptr.vmem [resolvable:$false] %s1006_s27 }
 0x305   : > { %s1008_s28 = scalar_lea.vmem %s1007_s27, 512  ;;  %p1009_p2 = scmp.lt.s32.totalorder %s1239_s11, %s1007_s27 }
 0x306   : > { %p1010_p3 = scmp.lt.s32.totalorder %s1008_s28, %s1002_s16 }
 0x308   : > { %p1011_p4 = por %p1010_p3, %p1009_p2 }
 0x30a   : > { %p1012_p7 = pnand %p1011_p4, %p1005_p12 }
 0x36e   : > { %v519_v29 = vpop.permute.xlu0 %518 }
 0x36f   : > { %v522_v31 = vrot.slane %v519_v29, 2 }
 0x371   : > { %v524_v36 = vadd.bf16 %v522_v31, %v514_v32  ;;  %v525_v37 = vadd.bf16 %v522_v31, %v515_v35 }
 0x372   : > { %v533_v30 = vpop.permute.xlu0 %532 }
 0x373   : > { %v540_v33 = vrot.slane %v533_v30, 4 }
 0x376   : > { %v531_v34 = vpop.permute.xlu1 %530 }
 0x377   : > { %v539_v1 = vrot.slane %v531_v34, 4 }
 0x379   : > { %v544_v38 = vadd.bf16 %v539_v1, %v524_v36  ;;  %v541_v39 = vsel %vm538_vm5, %v539_v1, %v540_v33 }
 0x37a   : > { %v545_v40 = vadd.bf16 %v541_v39, %v525_v37 }
 0x37b   : > { %v574_v41 = vrot.slane %v544_v38, 6 }
 0x37c   : > { %v575_v42 = vrot.slane %v545_v40, 6 }
 0x37e   : > { %v576_v43 = vsel %vm573_vm6, %v574_v41, %v575_v42 }
 0x37f   : > { %888 = vmatmul.mubr.bf16.vlgmr.msra.gmra.mrb[4].mxu0 %v576_v43 }
 0x452   : > { %v660_v45 = vpop.f32.mrb[4].mxu0 }
 0x453   : > { %v661_v46 = vadd.f32 %v788_v44, %v660_v45  ;;  %v889_v47 = vpop.f32.mrb[5].mxu0 }
 0x454   : > { %v663_v48 = vpop.f32.mrb[6].mxu0 }
 0x455   : > { %v667_v49 = vmax.f32 %v661_v46, 0.0  ;;  %v664_v50 = vadd.f32 %v788_v44, %v663_v48  ;;  %v890_v51 = vpop.f32.mrb[7].mxu0 }
 0x457   : > { %669 = vst [vmem:[%s178_s10] sm:$0xff] %v667_v49  ;;  %v668_v52 = vmax.f32 %v664_v50, 0.0 }
 0x459   : > { %670 = vst [vmem:[%s178_s10 + $0x8] sm:$0xff] %v668_v52 }
 0x45a   : > { %1015 = shalt.err (!%p1012_p7)
}
 0x45b   : > { %s1016_s29 = scalar_lea.hbm %s1244_s24, 256  ;;  %s1020_s5 = scalar_lea.hbm %s1290_s3, 512 }
 0x45c   : > { %p1017_p8 = scmp.ne.s32.totalorder %s1244_s24, %s1016_s29  ;;  %p1021_p1 = scmp.lt.u32.totalorder %s1244_s24, %s1290_s3 }
 0x45d   : > { %p1022_p0 = scmp.lt.u32.totalorder %s1020_s5, %s1016_s29  ;;  %p1024_p6 = scmp.lt.u32.totalorder %s1016_s29, %s1244_s24 }
 0x45e   : > { %p1018_p11 = pnand %p1017_p8, %p1301_p9 }
 0x45f   : > { %p1023_p5 = por %p1022_p0, %p1021_p1 }
 0x460   : > { %p1019_p13 = pneg %p1018_p11 }
 0x461   : > { %p1025_p10 = por %p1024_p6, %p1023_p5 }
 0x463   : > { %p1026_p12 = pnand %p1025_p10, %p1019_p13 }
 0x465   : > { %1029 = shalt.err (!%p1026_p12)
}
 0x466   : > { %s1079_s8 = smov 128   ;;  %s1080_s9 = smov 8  }
 0x467   : > { %895 = dma.vmem_to_hbm [thread:$0]  (%p1301_p9), %s1239_s11, 256, %s1244_s24, %s1246_s25, %s1079_s8, %s1079_s8, %s1080_s9  }
 0x468 PF: > { %p907_p2 = scmp.ge.s32.totalorder %s1068_s15, 2  ;;  %s700_s10 = sand.u32 1, %s1056_s12  }
 0x469   : > { %p1302_p3 = scmp.ne.s32.totalorder %s1295_s23, 0  ;;  %s701_s17 = scalar_lea.sflag [#allocation5], %s700_s10 }
 0x46b   : > { %p902_p4 = pnand %p907_p2, %p1302_p3 }
 0x46d   : > { %1051 = dma.done.wait (!%p902_p4), %s701_s17, 256  }
 0x46e   : > { %1053 = vsyncadd (!%p902_p4), %s701_s17, 4294967040  ;;  %p14_p7 = scmp.ge.s32.totalorder %s1126_s18, 4   ;;  %s1303_s12 = smov %s1060_s13 }
 0x46f   : > { %s1304_s13 = smov %s1064_s14  ;;  %s1305_s14 = smov %s1137_s21 }
 0x470   : > { %s1306_s15 = smov %s1126_s18  ;;  %16 = sbr.rel (!%p14_p7) target bundleno = 4 (0x4), region = 76 }
 0x477   :  { %706 = vsyncpa [#allocation4], 1 }
 0x478   :  { %708 = vsyncpa [#allocation4 + $0x1], 1 }
 0x479   :  { %709 = vsyncpa [#allocation5], 1 }
 0x47a   :  { %711 = vsyncpa [#allocation5 + $0x1], 1 }

</bundles_post_ra>
